<compile_context>
chip_gen: v7x
topology: tpu7x:2x2x1
jax: 0.10.0
libtpu: 0.0.40
codegen_flags: <defaults>
</compile_context>

<pallas_src>
import math

import jax
import jax.numpy as jnp
from jax.experimental import pallas as pl
from jax.experimental.pallas import tpu as pltpu

NEG_SLOPE = 0.2      # LeakyReLU negative_slope
NEG_BIG = -1e30      # "no edge" sentinel in the fused bias matrix


# ----------------------------- Pallas kernel --------------------------------
def _hgn_kernel(hl_ref, hr_ref, lse_ref, bias_ref, ht_ref, out_ref, attn_ref):
    """One (head-tile i, tail-tile j) grid step.

    grid = (n_i, n_j); j (tails) is the reduction axis ("arbitrary").
    The out block (tile_m, fout_p) is resident across j and accumulated in
    place; the attn block (tile_m, tile_n) is streamed straight to HBM.
    """
    j = pl.program_id(1)

    @pl.when(j == 0)
    def _init():
        out_ref[...] = jnp.zeros(out_ref.shape, out_ref.dtype)

    # Attention scores: f32 h_l / h_r broadcasts + bf16 fused edge bias
    # (he on existing edges, ~-1e30 elsewhere).
    s = hl_ref[...] + hr_ref[...] + bias_ref[...].astype(jnp.float32)
    s = jnp.maximum(s, NEG_SLOPE * s)                       # LeakyReLU

    # Exactly-normalized softmax via precomputed per-row logsumexp.
    # Non-edges carry ~-1e30 -> exp underflows to exactly 0, so no mask/where.
    p = jnp.exp(s - lse_ref[...])
    p_bf = p.astype(jnp.bfloat16)                           # reused: attn + MXU

    attn_ref[...] = p_bf                                    # streamed bf16 store
    out_ref[...] += jnp.dot(p_bf, ht_ref[...],
                            preferred_element_type=jnp.float32)


# ------------------------------ helpers --------------------------------------
def _round_up(x, m):
    return ((x + m - 1) // m) * m


def _tpu_generation():
    """Best-effort TPU generation (5 / 6 / 7); 0 if unknown."""
    try:
        kind = jax.devices()[0].device_kind.lower()
    except Exception:
        return 0
    for g in (7, 6, 5, 4, 3):
        if f"v{g}" in kind:
            return g
    return 0


def _choose_tiles(nh, nt, gen):
    nh8 = _round_up(max(nh, 1), 8)
    # Tail (reduction) tile: lane-dense and large enough to amortize the
    # ~0.35us per-grid-step overhead; VMEM per step is tiny now that attn
    # streams, so 1024 is safe on every generation (incl. v7x 64 MiB VMEM).
    tile_n = min(1024, _round_up(max(nt, 1), 128))
    # Head tile: 128 saturates v5e's 4x128^2 MXU; v6e/v7x's 256-wide MXU
    # benefits from 256 once there are enough head rows.
    tile_m = 256 if (gen >= 6 and nh8 >= 512) else 128
    tile_m = min(tile_m, nh8)
    if gen >= 7 and nh8 >= 16:
        # v7x has 2 TensorCores/chip: guarantee >=2 tiles on the "parallel"
        # head axis so both cores get work.
        tile_m = min(tile_m, _round_up((nh8 + 1) // 2, 8))
    return tile_m, tile_n


# ------------------------------ wrapper --------------------------------------
def simple_hgn_layer(head_feat, tail_feat_list, adj_list, tmp_edge_list, params,
                     *, tile_m=None, tile_n=None):
    """Forward pass of SimpleHGNLayer (spilt_edge=False, eval mode)."""
    f32, bf16 = jnp.float32, jnp.bfloat16

    x_head = head_feat.astype(f32)                     # feat_drop = identity
    x_tail = jnp.concatenate(tail_feat_list, axis=0).astype(f32)
    edge_list = jnp.concatenate(adj_list, axis=1)      # [2, E]
    tmp_edge = jnp.concatenate(tmp_edge_list, axis=0)  # [E]

    nh, _fin = x_head.shape
    nt = x_tail.shape[0]
    fout = params["W"].shape[0]

    # ---- tiling (lane-dense last dims, generation-aware) ----
    tm_auto, tn_auto = _choose_tiles(nh, nt, _tpu_generation())
    tile_m = tm_auto if tile_m is None else tile_m          # must be mult of 8
    tile_n = tn_auto if tile_n is None else tile_n          # must be mult of 128
    nh_p = _round_up(nh, tile_m)
    nt_p = _round_up(nt, tile_n)
    fout_p = _round_up(fout, 128)
    n_i, n_j = nh_p // tile_m, nt_p // tile_n

    # ---- wrapper glue: O(N*F) / O(E), not the hot path ----
    W = params["W"].astype(f32)                              # [Fout, Fin]
    wt = W.T                                                 # [Fin, Fout]
    a_l = params["a_l"].reshape(-1).astype(f32)
    a_r = params["a_r"].reshape(-1).astype(f32)
    a_e = params["a_e"].reshape(-1).astype(f32)

    # Hoisted tail transform (review item 1) -- reused for h_r as well.
    h_tail = x_tail @ wt                                     # [Nt, Fout] f32
    hl = x_head @ (wt @ a_l)                                 # [Nh]  (no h_head)
    hr = h_tail @ a_r                                        # [Nt]

    e = params["edge_emb"].astype(f32) @ params["W_e"].astype(f32)
    he = e @ a_e                                             # [T]
    he_b = he.astype(bf16)                                   # bf16 used in bias
    he_f = he_b.astype(f32)                                  # same values, f32

    head_ind, tail_ind = edge_list[0], edge_list[1]

    # Fused dense edge bias (bf16): he on existing edges, -1e30 elsewhere.
    bias = jnp.full((nh_p, nt_p), NEG_BIG, bf16).at[head_ind, tail_ind].set(
        he_b[tmp_edge])

    # Per-head-row logsumexp of the LeakyReLU'd scores, computed sparsely over
    # the edge list (uses the same bf16-rounded he the kernel will see).
    s_edge = hl[head_ind] + hr[tail_ind] + he_f[tmp_edge]
    s_edge = jnp.maximum(s_edge, NEG_SLOPE * s_edge)
    m_row = jax.ops.segment_max(s_edge, head_ind, num_segments=nh)
    sum_row = jax.ops.segment_sum(jnp.exp(s_edge - m_row[head_ind]),
                                  head_ind, num_segments=nh)
    lse = m_row + jnp.log(sum_row)
    lse = jnp.where(jnp.isfinite(lse), lse, 0.0)   # isolated head rows -> zeros

    hl_p = jnp.zeros((nh_p, 1), f32).at[:nh, 0].set(hl)
    lse_p = jnp.zeros((nh_p, 1), f32).at[:nh, 0].set(lse)
    hr_p = jnp.zeros((1, nt_p), f32).at[0, :nt].set(hr)
    ht_p = jnp.zeros((nt_p, fout_p), bf16).at[:nt, :fout].set(h_tail.astype(bf16))

    out_p, attn_p = pl.pallas_call(
        _hgn_kernel,
        grid=(n_i, n_j),
        in_specs=[
            pl.BlockSpec((tile_m, 1), lambda i, j: (i, 0)),          # h_l
            pl.BlockSpec((1, tile_n), lambda i, j: (0, j)),          # h_r
            pl.BlockSpec((tile_m, 1), lambda i, j: (i, 0)),          # logsumexp
            pl.BlockSpec((tile_m, tile_n), lambda i, j: (i, j)),     # bias (bf16)
            pl.BlockSpec((tile_n, fout_p), lambda i, j: (j, 0)),     # h_tail (bf16)
        ],
        out_specs=(
            # out block resident across the j (reduction) axis; attn streamed.
            pl.BlockSpec((tile_m, fout_p), lambda i, j: (i, 0)),
            pl.BlockSpec((tile_m, tile_n), lambda i, j: (i, j)),
        ),
        out_shape=(
            jax.ShapeDtypeStruct((nh_p, fout_p), f32),
            jax.ShapeDtypeStruct((nh_p, nt_p), bf16),
        ),
        compiler_params=pltpu.CompilerParams(
            dimension_semantics=("parallel", "arbitrary"),
            vmem_limit_bytes=32 * 1024 * 1024),
    )(hl_p, hr_p, lse_p, bias, ht_p)

    out = out_p[:nh, :fout]
    # Module-faithful f32 attention (kernel-side writeback stays bf16).
    attn = attn_p[:nh, :nt].astype(f32)
    # node_residual=False, activation=None in this configuration.
    return out, [attn]


# ------------------------- deterministic parameters ---------------------------
def init_params(key, in_f, out_f, edge_f, num_edge_types):
    def uni(k, shape, fan_sum):
        stdv = math.sqrt(6.0 / fan_sum)
        return jax.random.uniform(k, shape, jnp.float32, -stdv, stdv)

    ks = jax.random.split(key, 6)
    return {
        "W": uni(ks[0], (out_f, in_f), out_f + in_f),            # W[srctype].weight
        "W_e": uni(ks[1], (edge_f, edge_f), 2 * edge_f),
        "edge_emb": uni(ks[2], (num_edge_types, edge_f), num_edge_types + edge_f),
        "a_l": uni(ks[3], (1, 1, out_f), 1 + out_f),
        "a_r": uni(ks[4], (1, 1, out_f), 1 + out_f),
        "a_e": uni(ks[5], (1, 1, edge_f), 1 + edge_f),
    }


# ------------------------------ reference ------------------------------------
def reference(head_feat, tail_feat, edge_list, tmp_edge, params):
    W = params["W"]
    h_tail = tail_feat @ W.T
    e = params["edge_emb"] @ params["W_e"]
    hl = jnp.sum(params["a_l"].reshape(1, -1) * (head_feat @ W.T), -1)
    hr = jnp.sum(params["a_r"].reshape(1, -1) * h_tail, -1)
    he = jnp.sum(params["a_e"].reshape(1, -1) * e, -1)
    head_ind, tail_ind = edge_list[0], edge_list[1]
    s = hl[head_ind] + hr[tail_ind] + he[tmp_edge]
    s = jnp.where(s >= 0.0, s, NEG_SLOPE * s)
    nh = head_feat.shape[0]
    m = jax.ops.segment_max(s, head_ind, num_segments=nh)
    ex = jnp.exp(s - m[head_ind])
    den = jax.ops.segment_sum(ex, head_ind, num_segments=nh)
    a = ex / den[head_ind]
    out = jnp.zeros((nh, W.shape[0]), jnp.float32).at[head_ind].add(
        a[:, None] * h_tail[tail_ind])
    return out


# -------------------------------- main ----------------------------------------
if __name__ == "__main__":
    IN_F, OUT_F, EDGE_F, N_EDGE_TYPES = 32, 32, 16, 3

    key = jax.random.PRNGKey(0)
    kp, kh, kt1, kt2 = jax.random.split(key, 4)
    params = init_params(kp, IN_F, OUT_F, EDGE_F, N_EDGE_TYPES)

    # ---------------- test 1: small graph, auto tiles (single grid step) ----
    NH, NT_PER_GROUP = 8, 8
    head_feat = jax.random.normal(kh, (NH, IN_F), jnp.float32)
    tail_feat_list = [jax.random.normal(kt1, (NT_PER_GROUP, IN_F), jnp.float32),
                      jax.random.normal(kt2, (NT_PER_GROUP, IN_F), jnp.float32)]

    heads1 = list(range(NH)) + list(range(NH))
    tails1 = [i % NT_PER_GROUP for i in range(NH)] + \
             [(i + 3) % NT_PER_GROUP for i in range(NH)]
    adj1 = jnp.array([heads1, tails1], jnp.int32)
    tmp1 = jnp.array([0] * NH + [1] * NH, jnp.int32)

    heads2 = list(range(NH))
    tails2 = [NT_PER_GROUP + (i + 1) % NT_PER_GROUP for i in range(NH)]
    adj2 = jnp.array([heads2, tails2], jnp.int32)
    tmp2 = jnp.array([2] * NH, jnp.int32)

    out, attn_list = simple_hgn_layer(head_feat, tail_feat_list,
                                      [adj1, adj2], [tmp1, tmp2], params)
    out = jax.block_until_ready(out)
    attn = jax.block_until_ready(attn_list[0])

    tail_feat = jnp.concatenate(tail_feat_list, 0)
    edge_list = jnp.concatenate([adj1, adj2], 1)
    tmp_edge = jnp.concatenate([tmp1, tmp2], 0)
    ref = reference(head_feat, tail_feat, edge_list, tmp_edge, params)

    assert out.shape == (NH, OUT_F) and attn.shape == (NH, 2 * NT_PER_GROUP)
    assert bool(jnp.all(jnp.isfinite(out)))
    assert bool(jnp.allclose(jnp.sum(attn, axis=1), 1.0, atol=2e-2))
    assert bool(jnp.allclose(out, ref, atol=2e-2, rtol=2e-2)), "mismatch vs reference"

    # -------- test 2: multi-tile grid (forced tiny tiles) + isolated head ---
    NH2, NTA, NTB = 32, 100, 100
    k2h, k2a, k2b = jax.random.split(jax.random.PRNGKey(1), 3)
    head2 = jax.random.normal(k2h, (NH2, IN_F), jnp.float32)
    tails_b = [jax.random.normal(k2a, (NTA, IN_F), jnp.float32),
               jax.random.normal(k2b, (NTB, IN_F), jnp.float32)]
    nt2 = NTA + NTB
    eh, et, ty = [], [], []
    for i in range(NH2 - 1):                 # head NH2-1 left isolated on purpose
        for k in range(3):
            eh.append(i)
            et.append((i * 7 + k * 41 + 5) % nt2)   # distinct tails per head
            ty.append((i + k) % N_EDGE_TYPES)
    adj_b = jnp.array([eh, et], jnp.int32)
    tmp_b = jnp.array(ty, jnp.int32)

    out2, attn2_list = simple_hgn_layer(head2, tails_b, [adj_b], [tmp_b], params,
                                        tile_m=8, tile_n=128)   # grid (4, 2)
    out2 = jax.block_until_ready(out2)
    attn2 = jax.block_until_ready(attn2_list[0])

    tail2 = jnp.concatenate(tails_b, 0)
    ref2 = reference(head2, tail2, adj_b, tmp_b, params)

    assert out2.shape == (NH2, OUT_F) and attn2.shape == (NH2, nt2)
    assert bool(jnp.all(jnp.isfinite(out2)))
    row_sums = jnp.sum(attn2, axis=1)
    assert bool(jnp.allclose(row_sums[:-1], 1.0, atol=2e-2))
    assert bool(jnp.allclose(row_sums[-1], 0.0, atol=1e-6))      # isolated head
    assert bool(jnp.allclose(out2[-1], 0.0, atol=1e-6))
    assert bool(jnp.allclose(out2, ref2, atol=2e-2, rtol=2e-2)), "mismatch (test 2)"

    print("KERNEL_OK")
</pallas_src>

<mosaic_0001>
module attributes {stable_mosaic.version = 11 : i64} {
  func.func @_hgn_kernel(%arg0: i32, %arg1: i32, %arg2: memref<8x1xf32, #tpu.memory_space<vmem>>, %arg3: memref<1x128xf32, #tpu.memory_space<vmem>>, %arg4: memref<8x1xf32, #tpu.memory_space<vmem>>, %arg5: memref<8x128xbf16, #tpu.memory_space<vmem>>, %arg6: memref<128x128xbf16, #tpu.memory_space<vmem>>, %arg7: memref<8x128xf32, #tpu.memory_space<vmem>>, %arg8: memref<8x128xbf16, #tpu.memory_space<vmem>>) attributes {dimension_semantics = [#tpu.dimension_semantics<parallel>, #tpu.dimension_semantics<arbitrary>], iteration_bounds = array<i64: 1, 1>, scalar_prefetch = 0 : i64, scratch_operands = 0 : i64, tpu.core_type = #tpu.core_type<tc>, window_params = [{transform_indices = @transform_0, window_bounds = array<i64: 8, 1>}, {transform_indices = @transform_1, window_bounds = array<i64: 1, 128>}, {transform_indices = @transform_2, window_bounds = array<i64: 8, 1>}, {transform_indices = @transform_3, window_bounds = array<i64: 8, 128>}, {transform_indices = @transform_4, window_bounds = array<i64: 128, 128>}, {transform_indices = @transform_5, window_bounds = array<i64: 8, 128>}, {transform_indices = @transform_6, window_bounds = array<i64: 8, 128>}]} {
    %c0_i32 = arith.constant 0 : i32
    %0 = arith.cmpi eq, %arg1, %c0_i32 : i32
    %1 = arith.extui %0 : i1 to i32
    %c0_i32_0 = arith.constant 0 : i32
    %2 = arith.cmpi ne, %1, %c0_i32_0 : i32
    scf.if %2 {
      %cst_17 = arith.constant 0.000000e+00 : f32
      %25 = vector.broadcast %cst_17 : f32 to vector<8x128xf32>
      %c0_18 = arith.constant 0 : index
      %c0_19 = arith.constant 0 : index
      %26 = vector.load %arg7[%c0_18, %c0_19] : memref<8x128xf32, #tpu.memory_space<vmem>>, vector<8x128xf32>
      tpu.vector_store %arg7[%c0_18, %c0_19], %25 {strides = array<i32>} : memref<8x128xf32, #tpu.memory_space<vmem>>, vector<8x128xf32>,
    } else {
    }
    %c0 = arith.constant 0 : index
    %c0_1 = arith.constant 0 : index
    %3 = vector.load %arg2[%c0, %c0_1] : memref<8x1xf32, #tpu.memory_space<vmem>>, vector<8x1xf32>
    %c0_2 = arith.constant 0 : index
    %c0_3 = arith.constant 0 : index
    %4 = vector.load %arg3[%c0_2, %c0_3] : memref<1x128xf32, #tpu.memory_space<vmem>>, vector<1x128xf32>
    %5 = vector.broadcast %3 : vector<8x1xf32> to vector<8x128xf32>
    %6 = vector.broadcast %4 : vector<1x128xf32> to vector<8x128xf32>
    %7 = arith.addf %5, %6 : vector<8x128xf32>
    %c0_4 = arith.constant 0 : index
    %c0_5 = arith.constant 0 : index
    %8 = vector.load %arg5[%c0_4, %c0_5] : memref<8x128xbf16, #tpu.memory_space<vmem>>, vector<8x128xbf16>
    %9 = arith.extf %8 : vector<8x128xbf16> to vector<8x128xf32>
    %10 = arith.addf %7, %9 : vector<8x128xf32>
    %cst = arith.constant 2.000000e-01 : f32
    %11 = vector.broadcast %cst : f32 to vector<8x128xf32>
    %12 = arith.mulf %11, %10 : vector<8x128xf32>
    %13 = arith.maximumf %10, %12 : vector<8x128xf32>
    %c0_6 = arith.constant 0 : index
    %c0_7 = arith.constant 0 : index
    %14 = vector.load %arg4[%c0_6, %c0_7] : memref<8x1xf32, #tpu.memory_space<vmem>>, vector<8x1xf32>
    %15 = vector.broadcast %14 : vector<8x1xf32> to vector<8x128xf32>
    %16 = arith.subf %13, %15 : vector<8x128xf32>
    %17 = math.exp %16 : vector<8x128xf32>
    %18 = arith.truncf %17 : vector<8x128xf32> to vector<8x128xbf16>
    %c0_8 = arith.constant 0 : index
    %c0_9 = arith.constant 0 : index
    %19 = vector.load %arg8[%c0_8, %c0_9] : memref<8x128xbf16, #tpu.memory_space<vmem>>, vector<8x128xbf16>
    tpu.vector_store %arg8[%c0_8, %c0_9], %18 {strides = array<i32>} : memref<8x128xbf16, #tpu.memory_space<vmem>>, vector<8x128xbf16>,
    %c0_10 = arith.constant 0 : index
    %c0_11 = arith.constant 0 : index
    %20 = vector.load %arg7[%c0_10, %c0_11] : memref<8x128xf32, #tpu.memory_space<vmem>>, vector<8x128xf32>
    %c0_12 = arith.constant 0 : index
    %c0_13 = arith.constant 0 : index
    %21 = vector.load %arg6[%c0_12, %c0_13] : memref<128x128xbf16, #tpu.memory_space<vmem>>, vector<128x128xbf16>
    %cst_14 = arith.constant dense<0.000000e+00> : vector<8x128xf32>
    %22 = tpu.matmul %18, %21, %cst_14 {dimension_numbers = #tpu.dot_dimension_numbers<[1], [0], [0], [1], [0, 0, 1, 1], [], []>} : vector<8x128xbf16>, vector<128x128xbf16>, vector<8x128xf32> -> vector<8x128xf32>
    %23 = arith.addf %20, %22 : vector<8x128xf32>
    %c0_15 = arith.constant 0 : index
    %c0_16 = arith.constant 0 : index
    %24 = vector.load %arg7[%c0_15, %c0_16] : memref<8x128xf32, #tpu.memory_space<vmem>>, vector<8x128xf32>
    tpu.vector_store %arg7[%c0_15, %c0_16], %23 {strides = array<i32>} : memref<8x128xf32, #tpu.memory_space<vmem>>, vector<8x128xf32>,
    return
  }
  func.func @transform_0(%arg0: i32, %arg1: i32) -> (i32, i32) {
    %c0_i32 = arith.constant 0 : i32
    %c0_i32_0 = arith.constant 0 : i32
    return %arg0, %c0_i32 : i32, i32
  }
  func.func @transform_1(%arg0: i32, %arg1: i32) -> (i32, i32) {
    %c0_i32 = arith.constant 0 : i32
    %c0_i32_0 = arith.constant 0 : i32
    return %c0_i32, %arg1 : i32, i32
  }
  func.func @transform_2(%arg0: i32, %arg1: i32) -> (i32, i32) {
    %c0_i32 = arith.constant 0 : i32
    %c0_i32_0 = arith.constant 0 : i32
    return %arg0, %c0_i32 : i32, i32
  }
  func.func @transform_3(%arg0: i32, %arg1: i32) -> (i32, i32) {
    %c0_i32 = arith.constant 0 : i32
    return %arg0, %arg1 : i32, i32
  }
  func.func @transform_4(%arg0: i32, %arg1: i32) -> (i32, i32) {
    %c0_i32 = arith.constant 0 : i32
    %c0_i32_0 = arith.constant 0 : i32
    return %arg1, %c0_i32 : i32, i32
  }
  func.func @transform_5(%arg0: i32, %arg1: i32) -> (i32, i32) {
    %c0_i32 = arith.constant 0 : i32
    %c0_i32_0 = arith.constant 0 : i32
    return %arg0, %c0_i32 : i32, i32
  }
  func.func @transform_6(%arg0: i32, %arg1: i32) -> (i32, i32) {
    %c0_i32 = arith.constant 0 : i32
    return %arg0, %arg1 : i32, i32
  }
}

</mosaic_0001>

<bundles_post_ra>
// kernel: tpu_custom_call.1
= control target key start
LH: loop header
LB: loop body
LE: loop exit
PB: predicated region body
PF: predicated region fallthrough
CT: control target
= control target key end

     0   :  { %12 = vsyncpa [#allocation3], 0  ;;  %s430_s0 = inlined_call_operand.vmem [shape: f32[8,1], index: 0, kind: input, shape index: {}]   ;;  %s431_s1 = inlined_call_operand.vmem [shape: f32[1,128], index: 1, kind: input, shape index: {}]   ;;  %s432_s2 = inlined_call_operand.vmem [shape: f32[8,1], index: 2, kind: input, shape index: {}]   ;;  %s433_s3 = inlined_call_operand.vmem [shape: bf16[8,128], index: 3, kind: input, shape index: {}]   ;;  %s434_s4 = inlined_call_operand.hbm [shape: bf16[128,128], index: 4, kind: input, shape index: {}]   ;;  %s435_s5 = inlined_call_operand.hbm [shape: f32[8,128], index: 5, kind: output, shape index: {0}]   ;;  %s436_s6 = inlined_call_operand.hbm [shape: bf16[8,128], index: 6, kind: output, shape index: {1}]  }
   0x1   :  { %13 = vsyncpa [#allocation4], 0 }
   0x2   :  { %14 = vsyncpa [#allocation7], 0  ;;  %s339_s21 = smov [#allocation2]   ;;  %s267_s25 = scalar_lea.hbm %s434_s4, 1024 }
   0x3   :  { %s28_s22 = sshll.u32 %s339_s21, 4  ;;  %p268_p0 = scmp.ne.s32.totalorder %s434_s4, %s267_s25  ;;  %s29_s22 = int_to_ptr.vmem [resolvable:$true] %s28_s22 }
   0x4   :  { %p271_p1 = scmp.lt.u32.totalorder %s267_s25, %s434_s4 }
   0x6   :  { %p273_p2 = pnand %p271_p1, %p268_p0 }
   0x8   :  { %276 = shalt.err (!%p273_p2)
}
   0x9   :  { %s277_s30 = scalar_lea.vmem %s29_s22, 1024  ;;  %p282_p4 = scmp.lt.s32.totalorder %s29_s22, %s29_s22 }
   0xa   :  { %p278_p3 = scmp.ne.s32.totalorder %s29_s22, %s277_s30  ;;  %p283_p5 = scmp.lt.s32.totalorder %s277_s30, %s277_s30 }
   0xc   :  { %p284_p6 = por %p283_p5, %p282_p4 }
   0xe   :  { %p285_p7 = pnand %p284_p6, %p278_p3 }
  0x10   :  { %288 = shalt.err (!%p285_p7)
}
  0x11   :  { %s340_s7 = smov 64   ;;  %s341_s8 = smov 4  }
  0x12   :  { %34 = dma.hbm_to_vmem [thread:$0]  %s434_s4, 1024, %s29_s22, [#allocation3], %s340_s7, %s340_s7, %s341_s8  }
  0x13   :  { %333 = dma.done.wait [#allocation3], 1024  }
  0x14   :  { %334 = vsyncadd [#allocation3], 4294966272  ;;  %v342_v0 = vmov 0   ;;  %v343_v1 = vmov 0.0   ;;  %v44_v2 = vld [vmem:[%s430_s0] sm:$0xff]  ;;  %v257_v3 = vld [vmem:[#allocation2] sm:$0xff]  }
  0x15   :  { %256 = vset.pattern.permute.xlu0 %v342_v0  ;;  %228 = vmatprep.subr.bf16.mxu0 %v343_v1  ;;  %v63_v4 = vld [vmem:[%s432_s2] sm:$0xff]  ;;  %v258_v5 = vld [vmem:[#allocation2 + $0x8] sm:$0xff]   ;;  %v259_v6 = vld [vmem:[#allocation2 + $0x10] sm:$0xff]   ;;  %vm344_vm0 = vmmov 0   ;;  %s345_s16 = smov [#allocation6]  }
  0x16   :  { %48 = vperm.xlu0 %256, %v44_v2   ;;  %229 = vmatpush3.bf16.msra.mxu0 %v257_v3  ;;  %v260_v7 = vld [vmem:[#allocation2 + $0x18] sm:$0xff]   ;;  %v261_v8 = vld [vmem:[#allocation2 + $0x20] sm:$0xff]   ;;  %v262_v9 = vld [vmem:[#allocation2 + $0x28] sm:$0xff]  }
  0x17   :  { %230 = vmatprep.subr.bf16.mxu0 %v343_v1  ;;  %244 = vmatprep.mubr.msk.bf16.mxu0 %vm344_vm0, %v343_v1  ;;  %v263_v10 = vld [vmem:[#allocation2 + $0x30] sm:$0xff]   ;;  %v264_v11 = vld [vmem:[#allocation2 + $0x38] sm:$0xff]  }
  0x18   :  { %v58_v12 = vld [vmem:[%s433_s3] sm:$0xf]  ;;  %s197_s3 = sshll.u32 %s345_s16, 4  ;;  %s198_s3 = int_to_ptr.vmem [resolvable:$true] %s197_s3 }
  0x19   :  { %v210_v13 = vld [vmem:[%s431_s1] ss:$0 sm:$0xff]  ;;  %v59_v14 = vunpack.c.l.bf16 %v58_v12  ;;  %s289_s17 = scalar_lea.vmem %s198_s3, 64  ;;  %p294_p9 = scmp.lt.s32.totalorder %s198_s3, %s198_s3 }
  0x1a   :  { %66 = vperm.xlu0 %256, %v63_v4   ;;  %231 = vmatpush3.bf16.msra.mxu0 %v258_v5  ;;  %p290_p8 = scmp.ne.s32.totalorder %s198_s3, %s289_s17  ;;  %p295_p10 = scmp.lt.s32.totalorder %s289_s17, %s289_s17 }
  0x1b   :  { %232 = vmatprep.subr.bf16.mxu0 %v343_v1 }
  0x1c   :  { %p296_p11 = por %p295_p10, %p294_p9 }
  0x1e   :  { %233 = vmatpush3.bf16.msra.mxu0 %v259_v6  ;;  %p297_p12 = pnand %p296_p11, %p290_p8 }
  0x1f   :  { %234 = vmatprep.subr.bf16.mxu0 %v343_v1 }
  0x22   :  { %235 = vmatpush3.bf16.msra.mxu0 %v260_v7 }
  0x23   :  { %236 = vmatprep.subr.bf16.mxu0 %v343_v1 }
  0x26   :  { %237 = vmatpush3.bf16.msra.mxu0 %v261_v8 }
  0x27   :  { %238 = vmatprep.subr.bf16.mxu0 %v343_v1 }
  0x2a   :  { %239 = vmatpush3.bf16.msra.mxu0 %v262_v9 }
  0x2b   :  { %240 = vmatprep.subr.bf16.mxu0 %v343_v1 }
  0x2e   :  { %241 = vmatpush3.bf16.msra.mxu0 %v263_v10 }
  0x2f   :  { %242 = vmatprep.subr.bf16.mxu0 %v343_v1 }
  0x32   :  { %243 = vmatpush3.bf16.msra.mxu0 %v264_v11 }
  0x95   :  { %v49_v15 = vpop.permute.xlu0 %48 }
  0x96   :  { %v57_v16 = vadd.f32 %v210_v13, %v49_v15 }
  0x98   :  { %v60_v17 = vadd.f32 %v59_v14, %v57_v16 }
  0x99   :  { %v67_v20 = vpop.permute.xlu0 %66 }
  0x9a   :  { %v61_v18 = vmul.f32 0.2, %v60_v17 }
  0x9c   :  { %v62_v19 = vmax.f32 %v60_v17, %v61_v18 }
  0x9e   :  { %v69_v21 = vsub.f32 %v62_v19, %v67_v20 }
  0xa0   :  { %v70_v22 = vmul.f32 1.442695, %v69_v21 }
  0xa2   :  { %265 = vpow2.f32 %v70_v22 }
  0xac   :  { %v266_v23 = vpop.eup %265 }
  0xad   :  { %v72_v24 = vpack.c.bf16 %v266_v23, %v266_v23 }
  0xaf   :  { %245 = vmatmul.mubr.bf16.vlgmr.msra.gmra.mrb[0].mxu0 %v72_v24  ;;  %73 = vst [vmem:[#allocation6] sm:$0xf] %v72_v24 }
  0xb0   :  { %300 = shalt.err (!%p297_p12)
}
  0xb1   :  { %s301_s19 = scalar_lea.hbm %s436_s6, 64 }
  0xb2   :  { %p302_p13 = scmp.ne.s32.totalorder %s436_s6, %s301_s19  ;;  %p305_p0 = scmp.lt.u32.totalorder %s301_s19, %s436_s6 }
  0xb4   :  { %p307_p1 = pnand %p305_p0, %p302_p13 }
  0xb6   :  { %310 = shalt.err (!%p307_p1)
}
  0xb7   :  { %200 = dma.vmem_to_hbm [thread:$0]  %s198_s3, 64, %s436_s6, [#allocation7]  }
  0xb8   :  { %s346_s26 = smov [#allocation5]  }
  0xb9   :  { %s187_s27 = sshll.u32 %s346_s26, 4  ;;  %s188_s27 = int_to_ptr.vmem [resolvable:$true] %s187_s27 }
  0xba   :  { %s311_s28 = scalar_lea.vmem %s188_s27, 128  ;;  %p316_p3 = scmp.lt.s32.totalorder %s188_s27, %s188_s27 }
  0xbb   :  { %p312_p2 = scmp.ne.s32.totalorder %s188_s27, %s311_s28  ;;  %p317_p4 = scmp.lt.s32.totalorder %s311_s28, %s311_s28 }
  0xbd   :  { %p318_p5 = por %p317_p4, %p316_p3 }
  0xbf   :  { %p319_p6 = pnand %p318_p5, %p312_p2 }
 0x182   :  { %v173_v25 = vpop.f32.mrb[0].mxu0 }
 0x183   :  { %v246_v26 = vpop.f32.mrb[1].mxu0  ;;  %180 = vst [vmem:[#allocation5] sm:$0xff] %v173_v25 }
 0x184   :  { %v176_v27 = vpop.f32.mrb[2].mxu0 }
 0x185   :  { %v247_v28 = vpop.f32.mrb[3].mxu0 }
 0x186   :  { %322 = shalt.err (!%p319_p6)
}
 0x187   :  { %s323_s7 = scalar_lea.hbm %s435_s5, 128 }
 0x188   :  { %p324_p7 = scmp.ne.s32.totalorder %s435_s5, %s323_s7  ;;  %p327_p8 = scmp.lt.u32.totalorder %s323_s7, %s435_s5 }
 0x18a   :  { %p329_p9 = pnand %p327_p8, %p324_p7 }
 0x18c   :  { %332 = shalt.err (!%p329_p9)
}
 0x18d   :  { %190 = dma.vmem_to_hbm [thread:$0]  %s188_s27, 128, %s435_s5, [#allocation4]  }
 0x18e   :  { %335 = dma.done.wait [#allocation4], 128  }
 0x18f   :  { %336 = vsyncadd [#allocation4], 4294967168 }
 0x190   :  { %337 = dma.done.wait [#allocation7], 64  }
 0x191   :  { %338 = vsyncadd [#allocation7], 4294967232 }
 0x192   :  { %207 = vsyncpa [#allocation3], 1 }
 0x193   :  { %208 = vsyncpa [#allocation4], 1 }
 0x194   :  { %209 = vsyncpa [#allocation7], 1 }

</bundles_post_ra>
